<compile_context>
chip_gen: v7x
topology: tpu7x:2x2x1
jax: 0.10.0
libtpu: 0.0.40
codegen_flags: <defaults>
</compile_context>

<pallas_src>
import functools
import numpy as np

import jax
import jax.numpy as jnp
from jax.experimental import pallas as pl
from jax.experimental.pallas import tpu as pltpu


def _round_up(x, m):
    return ((x + m - 1) // m) * m


def _orthogonal_init(key, shape, gain):
    """Deterministic orthogonal init (mimics torch.nn.init.orthogonal_)."""
    rows, cols = shape
    flat_shape = (max(rows, cols), min(rows, cols))
    a = jax.random.normal(key, flat_shape, dtype=jnp.float32)
    q, r = jnp.linalg.qr(a)
    q = q * jnp.sign(jnp.diag(r))  # make it unique / uniform
    if rows < cols:
        q = q.T
    return gain * q[:rows, :cols]


def make_params(key, state_n, net_width):
    """Build W (in,out) / b (1,out) params matching the PyTorch module's shapes."""
    gain = float(np.sqrt(2.0))
    k1, k2, k3 = jax.random.split(key, 3)
    # torch Linear weight shape is (out, in); orthogonal_ is applied there, then transpose.
    w1 = _orthogonal_init(k1, (net_width, state_n), gain).T      # (state_n, net_width)
    w2 = _orthogonal_init(k2, (net_width, net_width), gain).T    # (net_width, net_width)
    w3 = _orthogonal_init(k3, (1, net_width), gain).T            # (net_width, 1)
    b1 = jnp.zeros((1, net_width), jnp.float32)
    b2 = jnp.zeros((1, net_width), jnp.float32)
    b3 = jnp.zeros((1, 1), jnp.float32)
    return w1, b1, w2, b2, w3, b3


def v_c_net_kernel(x_ref, w1_ref, b1_ref, w2_ref, b2_ref, w3r_ref, b3_ref, o_ref):
    x = x_ref[...]
    # Layer 1: MXU matmul, f32 accumulate; bias add + ReLU in f32 (v5e-safe elementwise).
    h1 = jnp.dot(x, w1_ref[...], preferred_element_type=jnp.float32) + b1_ref[...]
    h1 = jnp.maximum(h1, 0.0)
    # Layer 2: MXU matmul, f32 accumulate.
    h2 = jnp.dot(h1.astype(w2_ref.dtype), w2_ref[...],
                 preferred_element_type=jnp.float32) + b2_ref[...]
    h2 = jnp.maximum(h2, 0.0)
    # Layer 3 (out_features=1): VPU multiply + XLU lane-reduce instead of an N=1 MXU matmul;
    # b3 is a scalar read from SMEM.
    v = jnp.sum(h2 * w3r_ref[...], axis=-1, keepdims=True) + b3_ref[0, 0]
    o_ref[...] = v.astype(o_ref.dtype)


@functools.partial(jax.jit, static_argnames=("block_b", "compute_dtype"))
def v_c_net(state, w1, b1, w2, b2, w3, b3, *, block_b=512, compute_dtype=jnp.float32):
    B, state_n = state.shape
    net_width = w1.shape[1]

    # Batch tile: large (amortize per-step overhead), but keep >= 2 grid steps when the
    # batch allows it (v7x megacore), and 8-aligned for sublane tiling.
    bb = min(block_b, max(8, _round_up(pl.cdiv(B, 2), 8)))
    grid = (pl.cdiv(B, bb),)   # partial last tile handled by Pallas masking (no jnp.pad)

    x = state.astype(compute_dtype)            # no-op copy when already f32
    w1c = w1.astype(compute_dtype)
    w2c = w2.astype(compute_dtype)
    # Final layer weight as a (1, net_width) broadcast row; keep f32 for the VPU/XLU path.
    w3_row = w3.reshape(1, net_width).astype(jnp.float32)
    b3s = b3.reshape(1, 1).astype(jnp.float32)

    in_specs = [
        pl.BlockSpec((bb, state_n), lambda i: (i, 0)),            # state tile (batch-tiled)
        pl.BlockSpec((state_n, net_width), lambda i: (0, 0)),     # W1 (VMEM-resident)
        pl.BlockSpec((1, net_width), lambda i: (0, 0)),           # b1
        pl.BlockSpec((net_width, net_width), lambda i: (0, 0)),   # W2
        pl.BlockSpec((1, net_width), lambda i: (0, 0)),           # b2
        pl.BlockSpec((1, net_width), lambda i: (0, 0)),           # W3 as a row
        pl.BlockSpec(memory_space=pltpu.MemorySpace.SMEM),        # b3 scalar in SMEM
    ]
    # Output stays (B, 1) to match the module; writes are tiny (4 B/row) so the narrow
    # out_spec is not the bottleneck here.
    out_specs = pl.BlockSpec((bb, 1), lambda i: (i, 0))

    itemsize = jnp.dtype(compute_dtype).itemsize
    bytes_accessed = int(
        B * state_n * itemsize                                    # state in
        + (w1.size + w2.size) * itemsize                          # matmul weights
        + (w3.size + b1.size + b2.size + b3.size) * 4             # f32 params
        + B * 4                                                   # output
    )
    cost = pl.CostEstimate(
        flops=2 * B * (state_n * net_width + net_width * net_width + net_width),
        transcendentals=0,
        bytes_accessed=bytes_accessed,
    )

    out = pl.pallas_call(
        v_c_net_kernel,
        out_shape=jax.ShapeDtypeStruct((B, 1), jnp.float32),
        grid=grid,
        in_specs=in_specs,
        out_specs=out_specs,
        compiler_params=pltpu.CompilerParams(
            dimension_semantics=("parallel",)),
        cost_estimate=cost,
    )(x, w1c, b1, w2c, b2, w3_row, b3s)

    return out


def v_c_net_ref(state, w1, b1, w2, b2, w3, b3):
    h1 = jnp.maximum(state @ w1 + b1, 0.0)
    h2 = jnp.maximum(h1 @ w2 + b2, 0.0)
    return h2 @ w3 + b3


if __name__ == "__main__":
    key = jax.random.PRNGKey(0)
    k_param, k_state = jax.random.split(key)

    state_n = 16    # state dimension
    net_width = 32  # hidden width
    batch = 16

    params = make_params(k_param, state_n, net_width)
    state = jax.random.normal(k_state, (batch, state_n), dtype=jnp.float32)

    v = v_c_net(state, *params)           # f32 path (tight tolerances; v5e-safe)
    v = jax.block_until_ready(v)

    v_ref = v_c_net_ref(state, *params)
    np.testing.assert_allclose(np.asarray(v), np.asarray(v_ref), rtol=1e-5, atol=1e-5)

    # Also exercise an odd batch that is not a multiple of the tile (masked partial tile,
    # multi-step grid, no input padding copy).
    big_state = jax.random.normal(jax.random.PRNGKey(1), (250, state_n), dtype=jnp.float32)
    v_big = jax.block_until_ready(v_c_net(big_state, *params))
    v_big_ref = v_c_net_ref(big_state, *params)
    np.testing.assert_allclose(np.asarray(v_big), np.asarray(v_big_ref), rtol=1e-5, atol=1e-5)

    print("KERNEL_OK")
</pallas_src>

<mosaic_0001>
module attributes {stable_mosaic.version = 11 : i64} {
  func.func @v_c_net_kernel(%arg0: i32, %arg1: memref<8x16xf32, #tpu.memory_space<vmem>>, %arg2: memref<16x32xf32, #tpu.memory_space<vmem>>, %arg3: memref<1x32xf32, #tpu.memory_space<vmem>>, %arg4: memref<32x32xf32, #tpu.memory_space<vmem>>, %arg5: memref<1x32xf32, #tpu.memory_space<vmem>>, %arg6: memref<1x32xf32, #tpu.memory_space<vmem>>, %arg7: memref<1x1xf32, #tpu.memory_space<smem>>, %arg8: memref<8x1xf32, #tpu.memory_space<vmem>>) attributes {dimension_semantics = [#tpu.dimension_semantics<parallel>], iteration_bounds = array<i64: 2>, scalar_prefetch = 0 : i64, scratch_operands = 0 : i64, tpu.core_type = #tpu.core_type<tc>, window_params = [{transform_indices = @transform_0, window_bounds = array<i64: 8, 16>}, {pipeline_mode = #tpu.pipeline_mode<synchronous>, transform_indices = @transform_1, window_bounds = array<i64: 16, 32>}, {pipeline_mode = #tpu.pipeline_mode<synchronous>, transform_indices = @transform_2, window_bounds = array<i64: 1, 32>}, {pipeline_mode = #tpu.pipeline_mode<synchronous>, transform_indices = @transform_3, window_bounds = array<i64: 32, 32>}, {pipeline_mode = #tpu.pipeline_mode<synchronous>, transform_indices = @transform_4, window_bounds = array<i64: 1, 32>}, {pipeline_mode = #tpu.pipeline_mode<synchronous>, transform_indices = @transform_5, window_bounds = array<i64: 1, 32>}, {transform_indices = @transform_6, window_bounds = array<i64: 1, 1>}, {transform_indices = @transform_7, window_bounds = array<i64: 8, 1>}]} {
    %c0 = arith.constant 0 : index
    %c0_0 = arith.constant 0 : index
    %0 = vector.load %arg1[%c0, %c0_0] : memref<8x16xf32, #tpu.memory_space<vmem>>, vector<8x16xf32>
    %c0_1 = arith.constant 0 : index
    %c0_2 = arith.constant 0 : index
    %1 = vector.load %arg2[%c0_1, %c0_2] : memref<16x32xf32, #tpu.memory_space<vmem>>, vector<16x32xf32>
    %cst = arith.constant dense<0.000000e+00> : vector<8x32xf32>
    %2 = tpu.matmul %0, %1, %cst {dimension_numbers = #tpu.dot_dimension_numbers<[1], [0], [0], [1], [0, 0, 1, 1], [], []>} : vector<8x16xf32>, vector<16x32xf32>, vector<8x32xf32> -> vector<8x32xf32>
    %c0_3 = arith.constant 0 : index
    %c0_4 = arith.constant 0 : index
    %3 = vector.load %arg3[%c0_3, %c0_4] : memref<1x32xf32, #tpu.memory_space<vmem>>, vector<1x32xf32>
    %4 = vector.broadcast %3 : vector<1x32xf32> to vector<8x32xf32>
    %5 = arith.addf %2, %4 : vector<8x32xf32>
    %cst_5 = arith.constant 0.000000e+00 : f32
    %6 = vector.broadcast %cst_5 : f32 to vector<8x32xf32>
    %7 = arith.maximumf %5, %6 : vector<8x32xf32>
    %c0_6 = arith.constant 0 : index
    %c0_7 = arith.constant 0 : index
    %8 = vector.load %arg4[%c0_6, %c0_7] : memref<32x32xf32, #tpu.memory_space<vmem>>, vector<32x32xf32>
    %cst_8 = arith.constant dense<0.000000e+00> : vector<8x32xf32>
    %9 = tpu.matmul %7, %8, %cst_8 {dimension_numbers = #tpu.dot_dimension_numbers<[1], [0], [0], [1], [0, 0, 1, 1], [], []>} : vector<8x32xf32>, vector<32x32xf32>, vector<8x32xf32> -> vector<8x32xf32>
    %c0_9 = arith.constant 0 : index
    %c0_10 = arith.constant 0 : index
    %10 = vector.load %arg5[%c0_9, %c0_10] : memref<1x32xf32, #tpu.memory_space<vmem>>, vector<1x32xf32>
    %11 = vector.broadcast %10 : vector<1x32xf32> to vector<8x32xf32>
    %12 = arith.addf %9, %11 : vector<8x32xf32>
    %cst_11 = arith.constant 0.000000e+00 : f32
    %13 = vector.broadcast %cst_11 : f32 to vector<8x32xf32>
    %14 = arith.maximumf %12, %13 : vector<8x32xf32>
    %c0_12 = arith.constant 0 : index
    %c0_13 = arith.constant 0 : index
    %15 = vector.load %arg6[%c0_12, %c0_13] : memref<1x32xf32, #tpu.memory_space<vmem>>, vector<1x32xf32>
    %16 = vector.broadcast %15 : vector<1x32xf32> to vector<8x32xf32>
    %17 = arith.mulf %14, %16 : vector<8x32xf32>
    %cst_14 = arith.constant dense<0.000000e+00> : vector<8xf32>
    %18 = vector.multi_reduction <add>, %17, %cst_14 [1] : vector<8x32xf32> to vector<8xf32>
    %19 = vector.shape_cast %18 : vector<8xf32> to vector<8x1xf32>
    %c0_15 = arith.constant 0 : index
    %c0_16 = arith.constant 0 : index
    %20 = memref.load %arg7[%c0_15, %c0_16] : memref<1x1xf32, #tpu.memory_space<smem>>
    %21 = vector.broadcast %20 : f32 to vector<8x1xf32>
    %22 = arith.addf %19, %21 : vector<8x1xf32>
    %c0_17 = arith.constant 0 : index
    %c0_18 = arith.constant 0 : index
    %23 = vector.load %arg8[%c0_17, %c0_18] : memref<8x1xf32, #tpu.memory_space<vmem>>, vector<8x1xf32>
    tpu.vector_store %arg8[%c0_17, %c0_18], %22 {strides = array<i32>} : memref<8x1xf32, #tpu.memory_space<vmem>>, vector<8x1xf32>,
    return
  }
  func.func @transform_0(%arg0: i32) -> (i32, i32) {
    %c0_i32 = arith.constant 0 : i32
    %c0_i32_0 = arith.constant 0 : i32
    return %arg0, %c0_i32 : i32, i32
  }
  func.func @transform_1(%arg0: i32) -> (i32, i32) {
    %c0_i32 = arith.constant 0 : i32
    %c0_i32_0 = arith.constant 0 : i32
    %c0_i32_1 = arith.constant 0 : i32
    return %c0_i32, %c0_i32_0 : i32, i32
  }
  func.func @transform_2(%arg0: i32) -> (i32, i32) {
    %c0_i32 = arith.constant 0 : i32
    %c0_i32_0 = arith.constant 0 : i32
    %c0_i32_1 = arith.constant 0 : i32
    return %c0_i32, %c0_i32_0 : i32, i32
  }
  func.func @transform_3(%arg0: i32) -> (i32, i32) {
    %c0_i32 = arith.constant 0 : i32
    %c0_i32_0 = arith.constant 0 : i32
    %c0_i32_1 = arith.constant 0 : i32
    return %c0_i32, %c0_i32_0 : i32, i32
  }
  func.func @transform_4(%arg0: i32) -> (i32, i32) {
    %c0_i32 = arith.constant 0 : i32
    %c0_i32_0 = arith.constant 0 : i32
    %c0_i32_1 = arith.constant 0 : i32
    return %c0_i32, %c0_i32_0 : i32, i32
  }
  func.func @transform_5(%arg0: i32) -> (i32, i32) {
    %c0_i32 = arith.constant 0 : i32
    %c0_i32_0 = arith.constant 0 : i32
    %c0_i32_1 = arith.constant 0 : i32
    return %c0_i32, %c0_i32_0 : i32, i32
  }
  func.func @transform_6(%arg0: i32) -> (i32, i32) {
    %c0_i32 = arith.constant 0 : i32
    %c0_i32_0 = arith.constant 0 : i32
    %c0_i32_1 = arith.constant 0 : i32
    return %c0_i32, %c0_i32_0 : i32, i32
  }
  func.func @transform_7(%arg0: i32) -> (i32, i32) {
    %c0_i32 = arith.constant 0 : i32
    %c0_i32_0 = arith.constant 0 : i32
    return %arg0, %c0_i32 : i32, i32
  }
}

</mosaic_0001>

<bundles_post_ra>
// kernel: v_c_net.1
= control target key start
LH: loop header
LB: loop body
LE: loop exit
PB: predicated region body
PF: predicated region fallthrough
CT: control target
= control target key end

     0   :  { %s1072_s0 = inlined_call_operand.hbm [shape: f32[16,16], index: 0, kind: input, shape index: {}]   ;;  %s1073_s1 = inlined_call_operand.hbm [shape: f32[16,32], index: 1, kind: input, shape index: {}]   ;;  %s1074_s2 = inlined_call_operand.vmem [shape: f32[1,32], index: 2, kind: input, shape index: {}]   ;;  %s1075_s3 = inlined_call_operand.hbm [shape: f32[32,32], index: 3, kind: input, shape index: {}]   ;;  %s1076_s4 = inlined_call_operand.vmem [shape: f32[1,32], index: 4, kind: input, shape index: {}]   ;;  %s1077_s5 = inlined_call_operand.vmem [shape: f32[1,32], index: 5, kind: input, shape index: {}]   ;;  %s1078_s6 = inlined_call_operand.<no memory space> [shape: f32[1,1], index: 6, kind: input, shape index: {}]   ;;  %s1079_s7 = inlined_call_operand.vmem [shape: f32[16,1], index: 7, kind: output, shape index: {}]  }
   0x1   :  { %12 = sst [smem:[#allocation2]] %s1078_s6 }
   0x2   :  { %13 = vsyncpa [#allocation4], 0 }
   0x3   :  { %15 = vsyncpa [#allocation4 + $0x1], 0 }
   0x4   :  { %16 = vsyncpa [#allocation6], 0  ;;  %s891_s26 = smov 0   ;;  %s893_s27 = smov 0  }
   0x5   :  { %s895_s28 = smov 0   ;;  %s897_s29 = smov 0  }
   0x6 LB: > { %s910_s6 = sadd.s32 4294967295, %s838_s29   ;;  %p42_p0 = scmp.ne.s32.totalorder %s830_s27, %s826_s26  ;;  %s838_s29 = sphi %s897_s29, %s1094_s29   ;;  %s834_s28 = sphi %s895_s28, %s1093_s28   ;;  %s830_s27 = sphi %s893_s27, %s1092_s27   ;;  %s826_s26 = sphi %s891_s26, %s1091_s26  }
   0x7   : > { %p1080_p1 = scmp.eq.s32.totalorder %s910_s6, 0  ;;  %p596_p2 = scmp.ge.s32.totalorder %s838_s29, 1 }
   0x8   : > { %p205_p3 = scmp.lt.s32.totalorder %s838_s29, 3  ;;  %s840_s9 = smov [#allocation5]  }
   0x9   : > { %p918_p4 = por %p1080_p1, %p42_p0  ;;  %s217_s10 = sshll.u32 %s840_s9, 4  ;;  %s218_s10 = int_to_ptr.vmem [resolvable:$true] %s217_s10 }
   0xa   : > { %p922_p5 = pnand %p596_p2, %p205_p3  ;;  %s841_s12 = smov [#allocation7]  }
   0xb   : > { %s1083_s30 = scalar_select %p918_p4, 1, 0 }
   0xc   : > { %s1084_s8 = scalar_select %p922_p5, 1, 0 }
   0xd   : > { %p659_p6 = pneg %p922_p5  ;;  %s233_s13 = sshll.u32 %s841_s12, 4  ;;  %s934_s13 = int_to_ptr.vmem [resolvable:$true] %s233_s13 }
   0xe   : > { %s714_s16 = scalar_lea.hbm %s1073_s1, 256 }
   0xf   : > { %p930_p7 = pnand %p659_p6, %p1080_p1  ;;  %p715_p8 = scmp.ne.s32.totalorder %s1073_s1, %s714_s16 }
  0x10   : > { %p721_p12 = scmp.lt.u32.totalorder %s714_s16, %s1073_s1 }
  0x11   : > { %p716_p9 = pneg %p930_p7 }
  0x13   : > { %p717_p10 = pnand %p716_p9, %p715_p8 }
  0x15   : > { %p718_p11 = pneg %p717_p10 }
  0x17   : > { %p723_p13 = pnand %p721_p12, %p718_p11 }
  0x19   : > { %726 = shalt.err (!%p723_p13)
}
  0x1a   : > { %s727_s21 = scalar_lea.vmem %s218_s10, 256  ;;  %p735_p6 = scmp.lt.s32.totalorder %s218_s10, %s218_s10 }
  0x1b   : > { %p728_p0 = scmp.ne.s32.totalorder %s218_s10, %s727_s21  ;;  %p736_p1 = scmp.lt.s32.totalorder %s727_s21, %s727_s21 }
  0x1d   : > { %p730_p2 = pnand %p728_p0, %p716_p9  ;;  %p737_p4 = por %p736_p1, %p735_p6 }
  0x1f   : > { %p731_p3 = pneg %p730_p2 }
  0x21   : > { %p738_p5 = pnand %p737_p4, %p731_p3 }
  0x23   : > { %741 = shalt.err (!%p738_p5)
}
  0x24   : > { %s842_s22 = smov 128   ;;  %s843_s23 = smov 8  }
  0x25   : > { %662 = dma.hbm_to_vmem [thread:$0]  (!%p930_p7), %s1073_s1, 256, %s218_s10, [#allocation6], %s842_s22, %s842_s22, %s843_s23  }
  0x26   : > { %s742_s12 = scalar_lea.hbm %s1075_s3, 512 }
  0x27   : > { %p743_p8 = scmp.ne.s32.totalorder %s1075_s3, %s742_s12  ;;  %p749_p5 = scmp.lt.u32.totalorder %s742_s12, %s1075_s3 }
  0x29   : > { %p745_p1 = pnand %p743_p8, %p716_p9 }
  0x2b   : > { %p746_p4 = pneg %p745_p1 }
  0x2d   : > { %p751_p10 = pnand %p749_p5, %p746_p4 }
  0x2f   : > { %754 = shalt.err (!%p751_p10)
}
  0x30   : > { %s755_s10 = scalar_lea.vmem %s934_s13, 512  ;;  %p763_p0 = scmp.lt.s32.totalorder %s934_s13, %s934_s13 }
  0x31   : > { %p756_p11 = scmp.ne.s32.totalorder %s934_s13, %s755_s10  ;;  %p764_p2 = scmp.lt.s32.totalorder %s755_s10, %s755_s10 }
  0x33   : > { %p758_p12 = pnand %p756_p11, %p716_p9  ;;  %p765_p3 = por %p764_p2, %p763_p0 }
  0x35   : > { %p759_p13 = pneg %p758_p12 }
  0x37   : > { %p766_p6 = pnand %p765_p3, %p759_p13 }
  0x39   : > { %769 = shalt.err (!%p766_p6)
}
  0x3a   : > { %665 = dma.hbm_to_vmem [thread:$0]  (!%p930_p7), %s1075_s3, 512, %s934_s13, [#allocation6], %s842_s22, %s842_s22, %s843_s23  }
  0x3b   : > { %s984_s20 = sadd.s32 1, %s838_s29   ;;  %s29_s21 = sadd.s32 1, %s834_s28 }
  0x3c   : > { %s26_s11 = ssub.s32 %s838_s29, %s984_s20  ;;  %p36_p9 = scmp.ne.s32.totalorder %s834_s28, %s830_s27 }
  0x3d   : > { %p27_p8 = scmp.eq.s32.totalorder %s26_s11, 0  ;;  %p37_p1 = scmp.eq.s32.totalorder %s838_s29, 0 }
  0x3e   : > { %p672_p4 = scmp.lt.s32.totalorder %s838_s29, 2  ;;  %s256_s24 = sand.u32 1, %s834_s28  }
  0x3f   : > { %s995_s25 = scalar_select %p27_p8, %s834_s28, %s29_s21  }
  0x40   : > { %p38_p5 = por %p37_p1, %p36_p9  ;;  %s600_s26 = sshll.u32 %s256_s24, 3 }
  0x41   : > { %s601_s9 = sshll.u32 %s838_s29, 7  ;;  %s260_s13 = scalar_lea.vmem [#allocation3], %s600_s26 }
  0x42   : > { %s1001_s15 = scalar_lea.hbm %s1072_s0, %s601_s9  ;;  %s267_s22 = sshll.u32 %s260_s13, 4  ;;  %s1007_s22 = int_to_ptr.vmem [resolvable:$true] %s267_s22 }
  0x43   : > { %p1003_p7 = pnand %p672_p4, %p38_p5  ;;  %s257_s29 = scalar_lea.sflag [#allocation4], %s256_s24 }
  0x44   : > { %s770_s16 = scalar_lea.hbm %s1001_s15, 128  ;;  %s775_s18 = scalar_lea.hbm %s1072_s0, 256 }
  0x45   : > { %p771_p10 = scmp.ne.s32.totalorder %s1001_s15, %s770_s16  ;;  %p772_p11 = pneg %p1003_p7 }
  0x46   : > { %p776_p0 = scmp.lt.u32.totalorder %s1001_s15, %s1072_s0  ;;  %p777_p2 = scmp.lt.u32.totalorder %s775_s18, %s770_s16 }
  0x47   : > { %p773_p12 = pnand %p772_p11, %p771_p10  ;;  %p779_p6 = scmp.lt.u32.totalorder %s770_s16, %s1001_s15 }
  0x48   : > { %p778_p3 = por %p777_p2, %p776_p0 }
  0x49   : > { %p774_p13 = pneg %p773_p12 }
  0x4a   : > { %p780_p9 = por %p779_p6, %p778_p3 }
  0x4c   : > { %p781_p8 = pnand %p780_p9, %p774_p13 }
  0x4e   : > { %784 = shalt.err (!%p781_p8)
}
  0x4f   : > { %s785_s11 = scalar_lea.vmem %s1007_s22, 128  ;;  %s844_s24 = smov [#allocation3]  }
  0x50   : > { %p786_p1 = scmp.ne.s32.totalorder %s1007_s22, %s785_s11  ;;  %s790_s26 = sshll.u32 %s844_s24, 4  ;;  %s791_s26 = int_to_ptr.vmem [resolvable:$false] %s790_s26 }
  0x51   : > { %s792_s9 = scalar_lea.vmem %s791_s26, 256  ;;  %p793_p10 = scmp.lt.s32.totalorder %s1007_s22, %s791_s26 }
  0x52   : > { %p788_p4 = pnand %p786_p1, %p772_p11  ;;  %p794_p12 = scmp.lt.s32.totalorder %s792_s9, %s785_s11 }
  0x54   : > { %p789_p5 = pneg %p788_p4  ;;  %p795_p0 = por %p794_p12, %p793_p10 }
  0x56   : > { %p796_p2 = pnand %p795_p0, %p789_p5 }
  0x58   : > { %799 = shalt.err (!%p796_p2)
}
  0x59   : > { %669 = dma.hbm_to_vmem [thread:$0]  (!%p1003_p7), %s1001_s15, 128, %s1007_s22, %s257_s29  }
  0x5a   : > { %p1087_p13 = scmp.ne.s32.totalorder %s1084_s8, 0 }
  0x5b   : > { %s278_s12 = sand.u32 (!%p1087_p13), 1, %s830_s27   ;;  %p1088_p11 = scmp.ne.s32.totalorder (!%p1087_p13), %s1083_s30, 0 }
  0x5c   : > { %276 = sbr.rel (%p1087_p13) target bundleno = 689 (0x2b1), region = 48  ;;  %s603_s14 = sshll.u32 (!%p1087_p13), %s278_s12, 3 }
  0x5d   : > { %s279_s13 = scalar_lea.sflag (!%p1087_p13), [#allocation4], %s278_s12  ;;  %s282_s16 = scalar_lea.vmem (!%p1087_p13), [#allocation3], %s603_s14 }
  0x63   : > { %817 = dma.done.wait (%p1088_p11), %s279_s13, 128  }
  0x64   : > { %819 = vsyncadd (%p1088_p11), %s279_s13, 4294967168  ;;  %p1089_p3 = scmp.eq.s32.totalorder %s910_s6, 0 }
  0x66   : > { %821 = dma.done.wait (%p1089_p3), [#allocation6], 768   ;;  %p1090_p6 = pmov %p1089_p3 }
  0x67   : > { %v845_v0 = vmov 0.0|0.0   ;;  %vm846_vm0 = vmmov 0   ;;  %v847_v1 = vmov 0.0   ;;  %v325_v2 = vld [vmem:[#allocation5] sm:$0xff]  ;;  %v326_v3 = vld [vmem:[#allocation5 + $0x8] sm:$0xff]  ;;  %v409_v5 = vld [vmem:[#allocation7] sm:$0xff] }
  0x68   : > { %823 = vsyncadd (%p1090_p6), [#allocation6], 4294966528  ;;  %640 = vmatprep.subr.bf16.mxu0 %v845_v0  ;;  %626 = vmatprep.mubr.msk.f32.mxu0 %vm846_vm0, %v847_v1  ;;  %v641_v4 = vpack.c.bf16 %v326_v3, %v325_v2  ;;  %v410_v6 = vld [vmem:[#allocation7 + $0x8] sm:$0xff]  ;;  %vm334_vm1 = vcmask 130048   ;;  %v411_v9 = vld [vmem:[#allocation7 + $0x10] sm:$0xff]  ;;  %vm420_vm2 = vcmask 261120  }
  0x69   : > { %643 = vmatprep.subr.bf16.mxu1 %v845_v0  ;;  %637 = vmatprep.mubr.msk.f32.mxu1 %vm846_vm0, %v847_v1  ;;  %v644_v7 = vpack.c.bf16 %v410_v6, %v409_v5  ;;  %v324_v8 = vld [vmem:[%s282_s16] sm:$0xff]  ;;  %v412_v10 = vld [vmem:[#allocation7 + $0x18] sm:$0xff]  ;;  %p320_p7 = scmp.lt.s32.totalorder %s910_s6, 1  ;;  %s506_s17 = sld [smem:[#allocation2]]  ;;  %vm509_vm3 = vcmask 7168  }
  0x6a   : > { %642 = vmatpush3.bf16.msra.mxu0 %v641_v4  ;;  %v647_v11 = vpack.c.bf16 %v412_v10, %v411_v9  ;;  %v607_v12 = vld [vmem:[%s1074_s2] ss:$0 sm:$0xff] }
  0x6b   : > { %645 = vmatpush3.bf16.msra.mxu1 %v644_v7  ;;  %v609_v17 = vld [vmem:[%s1076_s4] ss:$0 sm:$0xff]  ;;  %s1096_s6 = smov (!%p320_p7, %s910_s6), 1 }
  0x6c   : > { %646 = vmatprep.subr.bf16.mxu1 %v845_v0  ;;  %v611_v21 = vld [vmem:[%s1077_s5] ss:$0 sm:$0xff]  ;;  %s606_s10 = sshll.u32 %s1096_s6, 3 }
  0x6d   : > { %627 = vmatmul.mubr.msk.f32.vlgmr.msra.gmra.mrb[0].mxu0 %vm334_vm1, %v324_v8  ;;  %s323_s21 = scalar_lea.vmem %s1079_s7, %s606_s10 }
  0x6f   : > { %648 = vmatpush3.bf16.msra.mxu1 %v647_v11  ;;  %v507_v25 = vstv %s506_s17 }
 0x140   : > { %v404_v13 = vpop.f32.mrb[0].mxu0 }
 0x141   : > { %v405_v14 = vadd.f32 %v607_v12, %v404_v13  ;;  %v628_v15 = vpop.f32.mrb[1].mxu0 }
 0x143   : > { %v408_v16 = vmax.f32 %v405_v14, 0.0 }
 0x145   : > { %638 = vmatmul.mubr.msk.f32.vlgmr.msra.gmra.mrb[0].mxu1 %vm420_vm2, %v408_v16 }
 0x218   : > { %v490_v18 = vpop.f32.mrb[0].mxu1 }
 0x219   : > { %v491_v19 = vadd.f32 %v609_v17, %v490_v18  ;;  %v639_v20 = vpop.f32.mrb[1].mxu1 }
 0x21b   : > { %v494_v22 = vmax.f32 %v491_v19, 0.0 }
 0x21d   : > { %v502_v23 = vmul.f32 %v611_v21, %v494_v22 }
 0x21f   : > { %v503_v24 = vsel %vm420_vm2, %v502_v23, 0.0 }
 0x220   : > { %504 = vadd.xlane.f32.xlu0 %v503_v24 }
 0x2ad   : > { %v505_v26 = vpop.xlane.xlu0 %504 }
 0x2ae   : > { %v508_v27 = vadd.f32 %v507_v25, %v505_v26 }
 0x2b0   : > { %510 = vst.msk [vmem:[%s323_s21] sm:$0xff] %vm509_vm3, %v508_v27 }
 0x2b1 PF: > { %p19_p9 = scmp.ge.s32.totalorder %s984_s20, 4   ;;  %s1091_s26 = smov %s830_s27 }
 0x2b2   : > { %s1092_s27 = smov %s834_s28  ;;  %s1093_s28 = smov %s995_s25 }
 0x2b3   : > { %s1094_s29 = smov %s984_s20  ;;  %21 = sbr.rel (!%p19_p9) target bundleno = 6 (0x6), region = 96 }
 0x2ba   :  { %530 = vsyncpa [#allocation4], 1 }
 0x2bb   :  { %532 = vsyncpa [#allocation4 + $0x1], 1 }
 0x2bc   :  { %533 = vsyncpa [#allocation6], 1 }

</bundles_post_ra>
